<compile_context>
chip_gen: v6e
topology: v6e:2x2x1
jax: 0.10.0
libtpu: 0.0.40
codegen_flags: <defaults>
</compile_context>

<pallas_src>
import functools
import math

import jax
import jax.numpy as jnp
from jax.experimental import pallas as pl
from jax.experimental.pallas import tpu as pltpu


def _convgru_kernel(patch1_ref, hcen_ref, w1_ref, w2_ref, out_ref,
                    patch2_ref, prh_ref, *, Ch, head, offs, n_cols, margin):
    """One grid step: a group of images folded into the lane (N) axis."""
    # ---- matmul 1: fused [update ; reset ; candidate-x-part] ----------------
    # patch1 rows = [9*Cin x-taps | 9*Ch h-taps | ones (bias) | zero pad].
    pre = jnp.dot(w1_ref[...], patch1_ref[0],
                  preferred_element_type=jnp.float32)            # (3*Ch, n_cols)
    z = jax.nn.sigmoid(pre[0:Ch, :])                              # update gate
    r = jax.nn.sigmoid(pre[Ch:2 * Ch, :])                         # reset gate
    o_x = pre[2 * Ch:3 * Ch, :]                                   # W_o_x * x + b_o

    hcen = hcen_ref[0]                                            # (Ch, n_cols)
    rh = r * hcen                                                 # r * h_prev

    # ---- build the 9 r*h taps -------------------------------------------------
    # prh is an output-indexed slab with a zeroed left margin: column
    # margin + c holds (r*h) at output index c.  Correctness of the "same"
    # conv zero padding relies on hcen's per-image tail columns [Lout, P)
    # being exactly zero (wrapper invariant) so every border tap reads 0.
    # All stores below are 8-row / 128-lane-aligned full f32 tiles.
    prh_ref[:, 0:margin] = jnp.zeros((Ch, margin), jnp.float32)
    prh_ref[:, margin:margin + n_cols] = rh
    for t, s in enumerate(offs):
        if s == head:                                             # center tap
            patch2_ref[t * Ch:(t + 1) * Ch, :] = rh
        else:
            d = margin + s - head
            patch2_ref[t * Ch:(t + 1) * Ch, :] = prh_ref[:, d:d + n_cols]

    # ---- matmul 2: candidate's r*h contribution (K = 9*Ch) --------------------
    o_pre = o_x + jnp.dot(w2_ref[...], patch2_ref[...],
                          preferred_element_type=jnp.float32)
    h_cand = jnp.tanh(o_pre)

    # h_new = (1 - z) * h_prev + z * h_candidate
    out_ref[0] = ((1.0 - z) * hcen + z * h_cand).astype(out_ref.dtype)


def conv_gru_cell(x, h_prev, params, *, batch_group=None):
    """ConvGRUCell forward.

    x:      (B, Cin, H, W) NCHW (same layout as the PyTorch module).
    h_prev: (B, Ch,  H, W) or None.
    Returns (B, Ch, H, W) in x.dtype.
    """
    B, Cin, H, W = x.shape
    Ch = params["w_update"].shape[0]
    if h_prev is None:
        # PyTorch uses zeros_like(x), which is only shape-consistent when
        # hidden_dim == input_dim; build hidden-shaped zeros explicitly.
        h_prev = jnp.zeros((B, Ch, H, W), x.dtype)

    # Batch grouping: fold G images into the matmul N axis per grid step.
    # Default keeps >= 2 grid steps when B >= 2 (v7x has 2 TensorCores).
    if batch_group is None:
        batch_group = max(1, B // 2)
    G = max(1, min(batch_group, B))
    Bp = ((B + G - 1) // G) * G           # batch padded to a multiple of G
    Bg = Bp // G                          # grid length

    Wp = W + 2                            # padded row pitch
    Limg = (H + 2) * Wp                   # padded flat image length
    Lout = H * Wp                         # flat output length (2 junk cols/row)
    head = Wp + 1                         # flat offset of output position 0
    P = ((Limg + 127) // 128) * 128       # per-image lane pitch (128-aligned)
    offs = tuple(dy * Wp + dx for dy in range(3) for dx in range(3))
    Lext = offs[-1] + P                   # extended flat length for tap slicing
    n_cols = G * P                        # matmul N per grid step
    margin = ((head + 127) // 128) * 128  # r*h slab margin (>= head, 128-aligned)

    K1 = 9 * Cin + 9 * Ch + 1             # x taps + h taps + ones (bias) row
    K1p = ((K1 + 7) // 8) * 8
    K2 = 9 * Ch

    f32 = jnp.float32

    def pad_batch(a):
        return jnp.pad(a, ((0, Bp - B), (0, 0), (0, 0), (0, 0)))

    def pad_flat(a):                      # (Bp,C,H,W) -> (Bp,C,Lext), zero padded
        a = jnp.pad(a, ((0, 0), (0, 0), (1, 1), (1, 1)))
        a = a.reshape(a.shape[0], a.shape[1], Limg)
        return jnp.pad(a, ((0, 0), (0, 0), (0, Lext - Limg))).astype(f32)

    def taps(a_ext):                      # (Bp,C,Lext) -> (Bp,9*C,P)
        return jnp.concatenate([a_ext[:, :, s:s + P] for s in offs], axis=1)

    xp = pad_flat(pad_batch(x))
    hp = pad_flat(pad_batch(h_prev))

    # Hoisted im2col patch for matmul 1 (built by XLA in the wrapper).
    patch1 = jnp.concatenate(
        [taps(xp), taps(hp),
         jnp.ones((Bp, 1, P), f32),
         jnp.zeros((Bp, K1p - K1, P), f32)], axis=1)              # (Bp, K1p, P)

    # h_prev at the output positions; tail columns [Lout, P) MUST stay zero
    # (the in-kernel r*h border taps rely on it for the conv zero padding).
    hcen = jnp.pad(hp[:, :, head:head + Lout],
                   ((0, 0), (0, 0), (0, P - Lout)))               # (Bp, Ch, P)

    def group(a):                         # (Bp,R,P) -> (Bg,R,G*P)
        R = a.shape[1]
        return (a.reshape(Bg, G, R, P).transpose(0, 2, 1, 3)
                 .reshape(Bg, R, n_cols))

    patch1 = group(patch1)
    hcen = group(hcen)

    # ---- weights --------------------------------------------------------------
    def flat_x(w):                        # (Ch,Cin+Ch,3,3) -> (Ch, 9*Cin)
        return jnp.transpose(w[:, :Cin], (0, 2, 3, 1)).reshape(Ch, 9 * Cin)

    def flat_h(w):                        # (Ch,Cin+Ch,3,3) -> (Ch, 9*Ch)
        return jnp.transpose(w[:, Cin:], (0, 2, 3, 1)).reshape(Ch, 9 * Ch)

    def rows(w, b, use_h):
        h_cols = flat_h(w) if use_h else jnp.zeros((Ch, 9 * Ch), f32)
        return jnp.concatenate([flat_x(w), h_cols, b.reshape(Ch, 1)], axis=1)

    w1 = jnp.concatenate(
        [rows(params["w_update"], params["b_update"], True),
         rows(params["w_reset"], params["b_reset"], True),
         rows(params["w_out"], params["b_out"], False)], axis=0)
    w1 = jnp.pad(w1, ((0, 0), (0, K1p - K1))).astype(f32)         # (3*Ch, K1p)
    w2 = flat_h(params["w_out"]).astype(f32)                      # (Ch, 9*Ch)

    kernel = functools.partial(_convgru_kernel, Ch=Ch, head=head, offs=offs,
                               n_cols=n_cols, margin=margin)

    grid_spec = pltpu.PrefetchScalarGridSpec(
        num_scalar_prefetch=0,
        grid=(Bg,),
        in_specs=[
            pl.BlockSpec((1, K1p, n_cols), lambda g: (g, 0, 0)),  # x/h tap patch
            pl.BlockSpec((1, Ch, n_cols), lambda g: (g, 0, 0)),   # h_prev centers
            pl.BlockSpec((3 * Ch, K1p), lambda g: (0, 0)),        # fused gate weights
            pl.BlockSpec((Ch, K2), lambda g: (0, 0)),             # candidate h weights
        ],
        out_specs=pl.BlockSpec((1, Ch, n_cols), lambda g: (g, 0, 0)),
        scratch_shapes=[
            pltpu.VMEM((K2, n_cols), f32),                 # r*h taps (matmul-2 RHS)
            pltpu.VMEM((Ch, 2 * margin + n_cols), f32),    # margin-padded r*h slab
        ],
    )

    out = pl.pallas_call(
        kernel,
        out_shape=jax.ShapeDtypeStruct((Bg, Ch, n_cols), x.dtype),
        grid_spec=grid_spec,
        compiler_params=pltpu.CompilerParams(
            dimension_semantics=("parallel",)),
    )(patch1, hcen, w1, w2)

    # Ungroup and drop the padding carried through the flat lane layout.
    out = (out.reshape(Bg, Ch, G, P).transpose(0, 2, 1, 3)
              .reshape(Bp, Ch, P)[:B, :, :Lout]
              .reshape(B, Ch, H, Wp)[:, :, :, :W])
    return out


def init_params(key, input_dim, hidden_dim, kernel_size=3):
    """PyTorch-layout params, nn.Conv2d default init (U(+-1/sqrt(fan_in)))."""
    fan_in = kernel_size * kernel_size * (input_dim + hidden_dim)
    bound = 1.0 / math.sqrt(fan_in)
    ks = jax.random.split(key, 6)

    def u(k, shape):
        return jax.random.uniform(k, shape, jnp.float32, -bound, bound)

    wshape = (hidden_dim, input_dim + hidden_dim, kernel_size, kernel_size)
    return {
        "w_update": u(ks[0], wshape), "b_update": u(ks[1], (hidden_dim,)),
        "w_reset":  u(ks[2], wshape), "b_reset":  u(ks[3], (hidden_dim,)),
        "w_out":    u(ks[4], wshape), "b_out":    u(ks[5], (hidden_dim,)),
    }


def ref_conv_gru_cell(x, h_prev, params):
    """Pure-JAX f32 reference matching the PyTorch semantics (NCHW / OIHW)."""
    def conv(inp, w, b):
        y = jax.lax.conv_general_dilated(
            inp, w, window_strides=(1, 1), padding="SAME",
            dimension_numbers=("NCHW", "OIHW", "NCHW"),
            preferred_element_type=jnp.float32,
            precision=jax.lax.Precision.HIGHEST)
        return y + b.reshape(1, -1, 1, 1)

    combined = jnp.concatenate([x, h_prev], axis=1)
    z = jax.nn.sigmoid(conv(combined, params["w_update"], params["b_update"]))
    r = jax.nn.sigmoid(conv(combined, params["w_reset"], params["b_reset"]))
    h_cand = jnp.tanh(conv(jnp.concatenate([x, r * h_prev], axis=1),
                           params["w_out"], params["b_out"]))
    return (1.0 - z) * h_prev + z * h_cand


if __name__ == "__main__":
    B, H, W = 2, 16, 16
    INPUT_DIM, HIDDEN_DIM = 4, 8

    key = jax.random.PRNGKey(0)
    kx, kh, kp = jax.random.split(key, 3)

    # Same NCHW layout as the PyTorch module: x is (2, 4, 16, 16).
    x = jax.random.normal(kx, (B, INPUT_DIM, H, W), jnp.float32)
    h_prev = jax.random.normal(kh, (B, HIDDEN_DIM, H, W), jnp.float32)
    params = init_params(kp, INPUT_DIM, HIDDEN_DIM)

    ref = jax.block_until_ready(ref_conv_gru_cell(x, h_prev, params))

    # Default grouping: grid=(2,), one image per step (keeps both v7x TCs busy).
    h_new = jax.block_until_ready(conv_gru_cell(x, h_prev, params))
    assert h_new.shape == (B, HIDDEN_DIM, H, W)
    err = float(jnp.max(jnp.abs(h_new - ref)))
    assert err < 1e-1, f"mismatch vs f32 reference (grid over batch): {err}"

    # Fully batch-folded path: grid=(1,), both images folded into the N axis.
    h_new2 = jax.block_until_ready(
        conv_gru_cell(x, h_prev, params, batch_group=B))
    err2 = float(jnp.max(jnp.abs(h_new2 - ref)))
    assert err2 < 1e-1, f"mismatch vs f32 reference (batch-folded): {err2}"

    # The two paths run identical per-column arithmetic -> must agree closely.
    err12 = float(jnp.max(jnp.abs(h_new - h_new2)))
    assert err12 < 1e-3, f"grouped vs ungrouped kernel mismatch: {err12}"

    print("KERNEL_OK")
</pallas_src>

<mosaic_0001>
module attributes {stable_mosaic.version = 11 : i64} {
  func.func @_convgru_kernel(%arg0: i32, %arg1: memref<1x112x384xf32, #tpu.memory_space<vmem>>, %arg2: memref<1x8x384xf32, #tpu.memory_space<vmem>>, %arg3: memref<24x112xf32, #tpu.memory_space<vmem>>, %arg4: memref<8x72xf32, #tpu.memory_space<vmem>>, %arg5: memref<1x8x384xf32, #tpu.memory_space<vmem>>, %arg6: memref<72x384xf32, #tpu.memory_space<vmem>>, %arg7: memref<8x640xf32, #tpu.memory_space<vmem>>) attributes {dimension_semantics = [#tpu.dimension_semantics<parallel>], iteration_bounds = array<i64: 2>, scalar_prefetch = 0 : i64, scratch_operands = 2 : i64, tpu.core_type = #tpu.core_type<tc>, window_params = [{transform_indices = @transform_0, window_bounds = array<i64: 1, 112, 384>}, {transform_indices = @transform_1, window_bounds = array<i64: 1, 8, 384>}, {pipeline_mode = #tpu.pipeline_mode<synchronous>, transform_indices = @transform_2, window_bounds = array<i64: 24, 112>}, {pipeline_mode = #tpu.pipeline_mode<synchronous>, transform_indices = @transform_3, window_bounds = array<i64: 8, 72>}, {transform_indices = @transform_4, window_bounds = array<i64: 1, 8, 384>}]} {
    %c0 = arith.constant 0 : index
    %c0_0 = arith.constant 0 : index
    %0 = vector.load %arg3[%c0, %c0_0] : memref<24x112xf32, #tpu.memory_space<vmem>>, vector<24x112xf32>
    %c0_1 = arith.constant 0 : index
    %c0_2 = arith.constant 0 : index
    %c0_3 = arith.constant 0 : index
    %1 = vector.load %arg1[%c0_1, %c0_2, %c0_3] : memref<1x112x384xf32, #tpu.memory_space<vmem>>, vector<1x112x384xf32>
    %2 = vector.shape_cast %1 : vector<1x112x384xf32> to vector<112x384xf32>
    %cst = arith.constant dense<0.000000e+00> : vector<24x384xf32>
    %3 = tpu.matmul %0, %2, %cst {dimension_numbers = #tpu.dot_dimension_numbers<[1], [0], [0], [1], [0, 0, 1, 1], [], []>} : vector<24x112xf32>, vector<112x384xf32>, vector<24x384xf32> -> vector<24x384xf32>
    %4 = vector.extract_strided_slice %3 {offsets = [0, 0], sizes = [8, 384], strides = [1, 1]} : vector<24x384xf32> to vector<8x384xf32>
    %5 = arith.negf %4 : vector<8x384xf32>
    %6 = math.exp %5 : vector<8x384xf32>
    %cst_4 = arith.constant 1.000000e+00 : f32
    %7 = vector.broadcast %cst_4 : f32 to vector<8x384xf32>
    %8 = arith.addf %7, %6 : vector<8x384xf32>
    %9 = arith.divf %7, %8 : vector<8x384xf32>
    %10 = vector.extract_strided_slice %3 {offsets = [8, 0], sizes = [8, 384], strides = [1, 1]} : vector<24x384xf32> to vector<8x384xf32>
    %11 = arith.negf %10 : vector<8x384xf32>
    %12 = math.exp %11 : vector<8x384xf32>
    %cst_5 = arith.constant 1.000000e+00 : f32
    %13 = vector.broadcast %cst_5 : f32 to vector<8x384xf32>
    %14 = arith.addf %13, %12 : vector<8x384xf32>
    %15 = arith.divf %13, %14 : vector<8x384xf32>
    %16 = vector.extract_strided_slice %3 {offsets = [16, 0], sizes = [8, 384], strides = [1, 1]} : vector<24x384xf32> to vector<8x384xf32>
    %c0_6 = arith.constant 0 : index
    %c0_7 = arith.constant 0 : index
    %c0_8 = arith.constant 0 : index
    %17 = vector.load %arg2[%c0_6, %c0_7, %c0_8] : memref<1x8x384xf32, #tpu.memory_space<vmem>>, vector<1x8x384xf32>
    %18 = vector.shape_cast %17 : vector<1x8x384xf32> to vector<8x384xf32>
    %19 = arith.mulf %15, %18 : vector<8x384xf32>
    %cst_9 = arith.constant 0.000000e+00 : f32
    %20 = vector.broadcast %cst_9 : f32 to vector<8x128xf32>
    %c0_10 = arith.constant 0 : index
    %c0_11 = arith.constant 0 : index
    %21 = vector.load %arg7[%c0_10, %c0_11] : memref<8x640xf32, #tpu.memory_space<vmem>>, vector<8x128xf32>
    tpu.vector_store %arg7[%c0_10, %c0_11], %20 {strides = array<i32>} : memref<8x640xf32, #tpu.memory_space<vmem>>, vector<8x128xf32>,
    %c0_12 = arith.constant 0 : index
    %c128 = arith.constant 128 : index
    %22 = vector.load %arg7[%c0_12, %c128] : memref<8x640xf32, #tpu.memory_space<vmem>>, vector<8x384xf32>
    tpu.vector_store %arg7[%c0_12, %c128], %19 {strides = array<i32>} : memref<8x640xf32, #tpu.memory_space<vmem>>, vector<8x384xf32>,
    %c0_13 = arith.constant 0 : index
    %c109 = arith.constant 109 : index
    %23 = vector.load %arg7[%c0_13, %c109] : memref<8x640xf32, #tpu.memory_space<vmem>>, vector<8x384xf32>
    %c0_14 = arith.constant 0 : index
    %c0_15 = arith.constant 0 : index
    %24 = vector.load %arg6[%c0_14, %c0_15] : memref<72x384xf32, #tpu.memory_space<vmem>>, vector<8x384xf32>
    tpu.vector_store %arg6[%c0_14, %c0_15], %23 {strides = array<i32>} : memref<72x384xf32, #tpu.memory_space<vmem>>, vector<8x384xf32>,
    %c0_16 = arith.constant 0 : index
    %c110 = arith.constant 110 : index
    %25 = vector.load %arg7[%c0_16, %c110] : memref<8x640xf32, #tpu.memory_space<vmem>>, vector<8x384xf32>
    %c8 = arith.constant 8 : index
    %c0_17 = arith.constant 0 : index
    %26 = vector.load %arg6[%c8, %c0_17] : memref<72x384xf32, #tpu.memory_space<vmem>>, vector<8x384xf32>
    tpu.vector_store %arg6[%c8, %c0_17], %25 {strides = array<i32>} : memref<72x384xf32, #tpu.memory_space<vmem>>, vector<8x384xf32>,
    %c0_18 = arith.constant 0 : index
    %c111 = arith.constant 111 : index
    %27 = vector.load %arg7[%c0_18, %c111] : memref<8x640xf32, #tpu.memory_space<vmem>>, vector<8x384xf32>
    %c16 = arith.constant 16 : index
    %c0_19 = arith.constant 0 : index
    %28 = vector.load %arg6[%c16, %c0_19] : memref<72x384xf32, #tpu.memory_space<vmem>>, vector<8x384xf32>
    tpu.vector_store %arg6[%c16, %c0_19], %27 {strides = array<i32>} : memref<72x384xf32, #tpu.memory_space<vmem>>, vector<8x384xf32>,
    %c0_20 = arith.constant 0 : index
    %c127 = arith.constant 127 : index
    %29 = vector.load %arg7[%c0_20, %c127] : memref<8x640xf32, #tpu.memory_space<vmem>>, vector<8x384xf32>
    %c24 = arith.constant 24 : index
    %c0_21 = arith.constant 0 : index
    %30 = vector.load %arg6[%c24, %c0_21] : memref<72x384xf32, #tpu.memory_space<vmem>>, vector<8x384xf32>
    tpu.vector_store %arg6[%c24, %c0_21], %29 {strides = array<i32>} : memref<72x384xf32, #tpu.memory_space<vmem>>, vector<8x384xf32>,
    %c32 = arith.constant 32 : index
    %c0_22 = arith.constant 0 : index
    %31 = vector.load %arg6[%c32, %c0_22] : memref<72x384xf32, #tpu.memory_space<vmem>>, vector<8x384xf32>
    tpu.vector_store %arg6[%c32, %c0_22], %19 {strides = array<i32>} : memref<72x384xf32, #tpu.memory_space<vmem>>, vector<8x384xf32>,
    %c0_23 = arith.constant 0 : index
    %c129 = arith.constant 129 : index
    %32 = vector.load %arg7[%c0_23, %c129] : memref<8x640xf32, #tpu.memory_space<vmem>>, vector<8x384xf32>
    %c40 = arith.constant 40 : index
    %c0_24 = arith.constant 0 : index
    %33 = vector.load %arg6[%c40, %c0_24] : memref<72x384xf32, #tpu.memory_space<vmem>>, vector<8x384xf32>
    tpu.vector_store %arg6[%c40, %c0_24], %32 {strides = array<i32>} : memref<72x384xf32, #tpu.memory_space<vmem>>, vector<8x384xf32>,
    %c0_25 = arith.constant 0 : index
    %c145 = arith.constant 145 : index
    %34 = vector.load %arg7[%c0_25, %c145] : memref<8x640xf32, #tpu.memory_space<vmem>>, vector<8x384xf32>
    %c48 = arith.constant 48 : index
    %c0_26 = arith.constant 0 : index
    %35 = vector.load %arg6[%c48, %c0_26] : memref<72x384xf32, #tpu.memory_space<vmem>>, vector<8x384xf32>
    tpu.vector_store %arg6[%c48, %c0_26], %34 {strides = array<i32>} : memref<72x384xf32, #tpu.memory_space<vmem>>, vector<8x384xf32>,
    %c0_27 = arith.constant 0 : index
    %c146 = arith.constant 146 : index
    %36 = vector.load %arg7[%c0_27, %c146] : memref<8x640xf32, #tpu.memory_space<vmem>>, vector<8x384xf32>
    %c56 = arith.constant 56 : index
    %c0_28 = arith.constant 0 : index
    %37 = vector.load %arg6[%c56, %c0_28] : memref<72x384xf32, #tpu.memory_space<vmem>>, vector<8x384xf32>
    tpu.vector_store %arg6[%c56, %c0_28], %36 {strides = array<i32>} : memref<72x384xf32, #tpu.memory_space<vmem>>, vector<8x384xf32>,
    %c0_29 = arith.constant 0 : index
    %c147 = arith.constant 147 : index
    %38 = vector.load %arg7[%c0_29, %c147] : memref<8x640xf32, #tpu.memory_space<vmem>>, vector<8x384xf32>
    %c64 = arith.constant 64 : index
    %c0_30 = arith.constant 0 : index
    %39 = vector.load %arg6[%c64, %c0_30] : memref<72x384xf32, #tpu.memory_space<vmem>>, vector<8x384xf32>
    tpu.vector_store %arg6[%c64, %c0_30], %38 {strides = array<i32>} : memref<72x384xf32, #tpu.memory_space<vmem>>, vector<8x384xf32>,
    %c0_31 = arith.constant 0 : index
    %c0_32 = arith.constant 0 : index
    %40 = vector.load %arg4[%c0_31, %c0_32] : memref<8x72xf32, #tpu.memory_space<vmem>>, vector<8x72xf32>
    %c0_33 = arith.constant 0 : index
    %c0_34 = arith.constant 0 : index
    %41 = vector.load %arg6[%c0_33, %c0_34] : memref<72x384xf32, #tpu.memory_space<vmem>>, vector<72x384xf32>
    %cst_35 = arith.constant dense<0.000000e+00> : vector<8x384xf32>
    %42 = tpu.matmul %40, %41, %cst_35 {dimension_numbers = #tpu.dot_dimension_numbers<[1], [0], [0], [1], [0, 0, 1, 1], [], []>} : vector<8x72xf32>, vector<72x384xf32>, vector<8x384xf32> -> vector<8x384xf32>
    %43 = arith.addf %16, %42 : vector<8x384xf32>
    %44 = math.tanh %43 : vector<8x384xf32>
    %cst_36 = arith.constant 1.000000e+00 : f32
    %45 = vector.broadcast %cst_36 : f32 to vector<8x384xf32>
    %46 = arith.subf %45, %9 : vector<8x384xf32>
    %47 = arith.mulf %46, %18 : vector<8x384xf32>
    %48 = arith.mulf %9, %44 : vector<8x384xf32>
    %49 = arith.addf %47, %48 : vector<8x384xf32>
    %c0_37 = arith.constant 0 : index
    %c0_38 = arith.constant 0 : index
    %c0_39 = arith.constant 0 : index
    %50 = vector.load %arg5[%c0_37, %c0_38, %c0_39] : memref<1x8x384xf32, #tpu.memory_space<vmem>>, vector<1x8x384xf32>
    %51 = vector.shape_cast %50 : vector<1x8x384xf32> to vector<8x384xf32>
    %52 = vector.shape_cast %49 : vector<8x384xf32> to vector<1x8x384xf32>
    tpu.vector_store %arg5[%c0_37, %c0_38, %c0_39], %52 {strides = array<i32>} : memref<1x8x384xf32, #tpu.memory_space<vmem>>, vector<1x8x384xf32>,
    return
  }
  func.func @transform_0(%arg0: i32) -> (i32, i32, i32) {
    %c0_i32 = arith.constant 0 : i32
    %c0_i32_0 = arith.constant 0 : i32
    %c0_i32_1 = arith.constant 0 : i32
    return %arg0, %c0_i32, %c0_i32_0 : i32, i32, i32
  }
  func.func @transform_1(%arg0: i32) -> (i32, i32, i32) {
    %c0_i32 = arith.constant 0 : i32
    %c0_i32_0 = arith.constant 0 : i32
    %c0_i32_1 = arith.constant 0 : i32
    return %arg0, %c0_i32, %c0_i32_0 : i32, i32, i32
  }
  func.func @transform_2(%arg0: i32) -> (i32, i32) {
    %c0_i32 = arith.constant 0 : i32
    %c0_i32_0 = arith.constant 0 : i32
    %c0_i32_1 = arith.constant 0 : i32
    return %c0_i32, %c0_i32_0 : i32, i32
  }
  func.func @transform_3(%arg0: i32) -> (i32, i32) {
    %c0_i32 = arith.constant 0 : i32
    %c0_i32_0 = arith.constant 0 : i32
    %c0_i32_1 = arith.constant 0 : i32
    return %c0_i32, %c0_i32_0 : i32, i32
  }
  func.func @transform_4(%arg0: i32) -> (i32, i32, i32) {
    %c0_i32 = arith.constant 0 : i32
    %c0_i32_0 = arith.constant 0 : i32
    %c0_i32_1 = arith.constant 0 : i32
    return %arg0, %c0_i32, %c0_i32_0 : i32, i32, i32
  }
}

</mosaic_0001>

<bundles_post_ra>
// kernel: tpu_custom_call.1
= control target key start
LH: loop header
LB: loop body
LE: loop exit
PB: predicated region body
PF: predicated region fallthrough
CT: control target
= control target key end

     0   :  { %s1970_s0 = inlined_call_operand.hbm [shape: f32[2,112,384], index: 0, kind: input, shape index: {}]   ;;  %s1971_s1 = inlined_call_operand.hbm [shape: f32[2,8,384], index: 1, kind: input, shape index: {}]   ;;  %s1972_s2 = inlined_call_operand.hbm [shape: f32[24,112], index: 2, kind: input, shape index: {}]   ;;  %s1973_s3 = inlined_call_operand.hbm [shape: f32[8,72], index: 3, kind: input, shape index: {}]   ;;  %s1974_s4 = inlined_call_operand.hbm [shape: f32[2,8,384], index: 4, kind: output, shape index: {}]  }
   0x1   :  { %1979 = sst [smem:[#allocation18_spill]] %s1970_s0 }
   0x2   :  { %1980 = sst [smem:[#allocation19_spill]] %s1972_s2 }
   0x3   :  { %9 = vsyncpa [#allocation5], 0 }
   0x4   :  { %11 = vsyncpa [#allocation5 + $0x1], 0 }
   0x5   :  { %12 = vsyncpa [#allocation8], 0 }
   0x6   :  { %14 = vsyncpa [#allocation8 + $0x1], 0 }
   0x7   :  { %15 = vsyncpa [#allocation11], 0 }
   0x8   :  { %16 = vsyncpa [#allocation6], 0 }
   0x9   :  { %18 = vsyncpa [#allocation6 + $0x1], 0  ;;  %s1542_s15 = smov 0   ;;  %s1544_s16 = smov 0  }
   0xa   :  { %s1546_s17 = smov 0   ;;  %s1548_s18 = smov 0  }
   0xb LB: > { %s1563_s19 = sadd.s32 4294967295, %s1496_s18   ;;  %s1077_s20 = sadd.s32 4294967294, %s1496_s18   ;;  %s1496_s18 = sphi %s1548_s18, %s2002_s18   ;;  %s1492_s17 = sphi %s1546_s17, %s2001_s17   ;;  %s1488_s16 = sphi %s1544_s16, %s2000_s16   ;;  %s1484_s15 = sphi %s1542_s15, %s1999_s15  }
   0xc   : > { %p44_p0 = scmp.ne.s32.totalorder %s1488_s16, %s1484_s15  ;;  %p1975_p1 = scmp.eq.s32.totalorder %s1563_s19, 0 }
   0xd   : > { %p142_p3 = scmp.eq.s32.totalorder %s1077_s20, 1  ;;  %p1078_p5 = scmp.ge.s32.totalorder %s1496_s18, 1 }
   0xe   : > { %p1572_p4 = por %p1975_p1, %p44_p0  ;;  %p149_p7 = scmp.lt.s32.totalorder %s1496_s18, 3 }
   0xf   : > { %p1577_p6 = por %p142_p3, %p44_p0  ;;  %s1498_s24 = smov [#allocation9]  }
  0x10   : > { %s1981_s21 = scalar_select %p1572_p4, 1, 0 }
  0x11   : > { %s1982_s22 = scalar_select %p1577_p6, 1, 0 }
  0x12   : > { %p1582_p8 = pnand %p1078_p5, %p149_p7  ;;  %s161_s25 = sshll.u32 %s1498_s24, 4  ;;  %s162_s25 = int_to_ptr.vmem [resolvable:$true] %s161_s25 }
  0x13   : > { %s1499_s27 = smov [#allocation10]   ;;  %s1323_s29 = scalar_lea.vmem %s162_s25, 384 }
  0x14   : > { %s1983_s23 = scalar_select %p1582_p8, 1, 0 }
  0x15   : > { %p1210_p9 = pneg %p1582_p8  ;;  %s175_s28 = sshll.u32 %s1499_s27, 4  ;;  %s176_s28 = int_to_ptr.vmem [resolvable:$true] %s175_s28 }
  0x16   : > { %p1324_p13 = scmp.ne.s32.totalorder %s162_s25, %s1323_s29  ;;  %p1331_p5 = scmp.lt.s32.totalorder %s162_s25, %s162_s25 }
  0x17   : > { %p1591_p11 = pnand %p1210_p9, %p1975_p1  ;;  %p1332_p7 = scmp.lt.s32.totalorder %s1323_s29, %s1323_s29 }
  0x19   : > { %p1314_p12 = pneg %p1591_p11  ;;  %p1333_p10 = por %p1332_p7, %p1331_p5 }
  0x1b   : > { %p1326_p0 = pnand %p1324_p13, %p1314_p12 }
  0x1d   : > { %p1327_p3 = pneg %p1326_p0 }
  0x1f   : > { %p1334_p9 = pnand %p1333_p10, %p1327_p3 }
  0x21   : > { %1337 = shalt.err (!%p1334_p9)
}
  0x22   : > { %s1500_s30 = smov 128   ;;  %s1501_s5 = smov 8  }
  0x23   : > { %s1985_s2 = sld [smem:[#allocation19_spill]]  ;;  %s1349_s8 = scalar_lea.vmem %s176_s28, 128 }
  0x24   : > { %p1350_p1 = scmp.ne.s32.totalorder %s176_s28, %s1349_s8  ;;  %p1357_p2 = scmp.lt.s32.totalorder %s176_s28, %s176_s28 }
  0x25   : > { %p1358_p6 = scmp.lt.s32.totalorder %s1349_s8, %s1349_s8 }
  0x26   : > { %p1352_p13 = pnand %p1350_p1, %p1314_p12 }
  0x27   : > { %p1359_p5 = por %p1358_p6, %p1357_p2 }
  0x28   : > { %p1353_p0 = pneg %p1352_p13 }
  0x29   : > { %1213 = dma.hbm_to_vmem [thread:$0]  (!%p1591_p11), %s1985_s2, 384, %s162_s25, [#allocation8], %s1500_s30, %s1500_s30, %s1501_s5  }
  0x2a   : > { %p1360_p10 = pnand %p1359_p5, %p1353_p0 }
  0x2c   : > { %1363 = shalt.err (!%p1360_p10)
}
  0x2d   : > { %1216 = dma.hbm_to_vmem [thread:$0]  (!%p1591_p11), %s1973_s3, 128, %s176_s28, [#allocation11]  }
  0x2e   : > { %s1614_s11 = sadd.s32 1, %s1496_s18   ;;  %s31_s12 = sadd.s32 1, %s1492_s17 }
  0x2f   : > { %s28_s13 = ssub.s32 %s1496_s18, %s1614_s11  ;;  %p38_p1 = scmp.ne.s32.totalorder %s1492_s17, %s1488_s16 }
  0x30   : > { %p29_p2 = scmp.eq.s32.totalorder %s28_s13, 0  ;;  %p39_p6 = scmp.eq.s32.totalorder %s1496_s18, 0 }
  0x31   : > { %p1986_p12 = scmp.eq.s32.totalorder %s1563_s19, 1  ;;  %p1230_p7 = scmp.lt.s32.totalorder %s1496_s18, 2 }
  0x32   : > { %s1630_s20 = scalar_select %p29_p2, %s1492_s17, %s31_s12  }
  0x33   : > { %p1624_p3 = por %p1986_p12, %p38_p1  ;;  %p40_p9 = por %p39_p6, %p38_p1 }
  0x34   : > { %s1633_s24 = sand.u32 1, %s1492_s17   ;;  %s1190_s26 = smul.u32 5376, %s1496_s18 }
  0x35   : > { %s1987_s14 = scalar_select %p1624_p3, 1, 0 }
  0x36   : > { %s1189_s25 = smul.u32 336, %s1633_s24  ;;  %p1637_p11 = pnand %p1230_p7, %p40_p9 }
  0x37   : > { %s1989_s0 = sld [smem:[#allocation18_spill]]  ;;  %s207_s7 = sand.u32 1, %s1496_s18  }
  0x38   : > { %s190_s5 = scalar_lea.vmem [#allocation4], %s1189_s25  ;;  %s187_s8 = scalar_lea.sflag [#allocation5], %s1633_s24 }
  0x39   : > { %s197_s6 = sshll.u32 %s190_s5, 4  ;;  %p1366_p0 = pneg %p1637_p11  ;;  %s1646_s6 = int_to_ptr.vmem [resolvable:$true] %s197_s6 }
  0x3d   : > { %s1644_s30 = scalar_lea.hbm %s1989_s0, %s1190_s26  ;;  %s1369_s13 = scalar_lea.hbm %s1989_s0, 10752 }
  0x3e   : > { %s1364_s9 = scalar_lea.hbm %s1644_s30, 5376  ;;  %p1370_p1 = scmp.lt.s32.totalorder %s1644_s30, %s1989_s0 }
  0x3f   : > { %p1365_p13 = scmp.ne.s32.totalorder %s1644_s30, %s1364_s9  ;;  %p1371_p2 = scmp.lt.s32.totalorder %s1369_s13, %s1364_s9 }
  0x41   : > { %p1367_p5 = pnand %p1366_p0, %p1365_p13  ;;  %p1372_p6 = por %p1371_p2, %p1370_p1 }
  0x43   : > { %p1368_p10 = pneg %p1367_p5 }
  0x45   : > { %p1373_p12 = pnand %p1372_p6, %p1368_p10 }
  0x47   : > { %1376 = shalt.err (!%p1373_p12)
}
  0x48   : > { %s1377_s25 = scalar_lea.vmem %s1646_s6, 5376  ;;  %s1502_s29 = smov [#allocation4]  }
  0x49   : > { %p1378_p7 = scmp.ne.s32.totalorder %s1646_s6, %s1377_s25  ;;  %s1382_s5 = sshll.u32 %s1502_s29, 4  ;;  %s1383_s5 = int_to_ptr.vmem [resolvable:$false] %s1382_s5 }
  0x4a   : > { %s1384_s10 = scalar_lea.vmem %s1383_s5, 10752  ;;  %p1385_p5 = scmp.lt.s32.totalorder %s1646_s6, %s1383_s5 }
  0x4b   : > { %p1380_p9 = pnand %p1378_p7, %p1366_p0  ;;  %p1386_p3 = scmp.lt.s32.totalorder %s1384_s10, %s1377_s25 }
  0x4d   : > { %p1381_p13 = pneg %p1380_p9  ;;  %p1387_p4 = por %p1386_p3, %p1385_p5 }
  0x4f   : > { %p1388_p1 = pnand %p1387_p4, %p1381_p13 }
  0x51   : > { %1391 = shalt.err (!%p1388_p1)
}
  0x52   : > { %s1503_s9 = smov 384   ;;  %s1504_s12 = smov 24  }
  0x53   : > { %1220 = dma.hbm_to_vmem [thread:$0]  (!%p1637_p11), %s1644_s30, 5376, %s1646_s6, %s187_s8, %s1503_s9, %s1503_s9, %s1504_s12  }
  0x54   : > { %s1191_s13 = smul.u32 24, %s1633_s24  ;;  %s208_s0 = scalar_lea.sflag [#allocation8], %s207_s7 }
  0x55   : > { %s1192_s26 = smul.u32 384, %s1496_s18  ;;  %s1397_s6 = scalar_lea.hbm %s1971_s1, 768 }
  0x56   : > { %s211_s5 = scalar_lea.vmem [#allocation7], %s1191_s13 }
  0x57   : > { %s1681_s29 = scalar_lea.hbm %s1971_s1, %s1192_s26  ;;  %s219_s10 = sshll.u32 %s211_s5, 4  ;;  %s220_s10 = int_to_ptr.vmem [resolvable:$true] %s219_s10 }
  0x58   : > { %s1392_s2 = scalar_lea.hbm %s1681_s29, 384  ;;  %p1398_p2 = scmp.lt.s32.totalorder %s1681_s29, %s1971_s1 }
  0x59   : > { %p1393_p4 = scmp.ne.s32.totalorder %s1681_s29, %s1392_s2  ;;  %p1399_p6 = scmp.lt.s32.totalorder %s1397_s6, %s1392_s2 }
  0x5b   : > { %p1395_p3 = pnand %p1393_p4, %p1366_p0  ;;  %p1400_p12 = por %p1399_p6, %p1398_p2 }
  0x5d   : > { %p1396_p10 = pneg %p1395_p3 }
  0x5f   : > { %p1401_p7 = pnand %p1400_p12, %p1396_p10 }
  0x61   : > { %1404 = shalt.err (!%p1401_p7)
}
  0x62   : > { %s1405_s12 = scalar_lea.vmem %s220_s10, 384  ;;  %s1505_s7 = smov [#allocation7]  }
  0x63   : > { %p1406_p9 = scmp.ne.s32.totalorder %s220_s10, %s1405_s12  ;;  %s1410_s13 = sshll.u32 %s1505_s7, 4  ;;  %s1411_s13 = int_to_ptr.vmem [resolvable:$false] %s1410_s13 }
  0x64   : > { %s1412_s26 = scalar_lea.vmem %s1411_s13, 768  ;;  %p1413_p1 = scmp.lt.s32.totalorder %s220_s10, %s1411_s13 }
  0x65   : > { %p1408_p13 = pnand %p1406_p9, %p1366_p0  ;;  %p1414_p4 = scmp.lt.s32.totalorder %s1412_s26, %s1405_s12 }
  0x67   : > { %p1409_p5 = pneg %p1408_p13  ;;  %p1415_p3 = por %p1414_p4, %p1413_p1 }
  0x69   : > { %p1416_p8 = pnand %p1415_p3, %p1409_p5 }
  0x6b   : > { %1419 = shalt.err (!%p1416_p8)
}
  0x6c   : > { %1223 = dma.hbm_to_vmem [thread:$0]  (!%p1637_p11), %s1681_s29, 384, %s220_s10, %s208_s0  }
  0x6d   : > { %p1990_p10 = scmp.ne.s32.totalorder %s1983_s23, 0 }
  0x6e   : > { %s1706_s2 = sand.u32 (!%p1990_p10), 1, %s1488_s16   ;;  %p1991_p0 = scmp.ne.s32.totalorder (!%p1990_p10), %s1981_s21, 0 }
  0x6f   : > { %228 = sbr.rel (%p1990_p10) target bundleno = 780 (0x30c), region = 36  ;;  %s231_s25 = scalar_lea.sflag (!%p1990_p10), [#allocation5], %s1706_s2 }
  0x70   : > { %s1193_s28 = smul.u32 (!%p1990_p10), 336, %s1706_s2 }
  0x72   : > { %s1710_s5 = scalar_lea.vmem (!%p1990_p10), [#allocation4], %s1193_s28 }
  0x74   : > { %1463 = dma.done.wait (%p1991_p0), %s231_s25, 5376  }
  0x75   : > { %1465 = vsyncadd (%p1991_p0), %s231_s25, 4294961920  ;;  %s239_s0 = sand.u32 1, %s1563_s19   ;;  %s1194_s23 = smul.u32 24, %s1706_s2 }
  0x76   : > { %s240_s27 = scalar_lea.sflag [#allocation8], %s239_s0 }
  0x77   : > { %s1720_s29 = scalar_lea.vmem [#allocation7], %s1194_s23 }
  0x78   : > { %1467 = dma.done.wait (%p1991_p0), %s240_s27, 384  }
  0x79   : > { %1469 = vsyncadd (%p1991_p0), %s240_s27, 4294966912  ;;  %p1992_p8 = scmp.eq.s32.totalorder %s1563_s19, 0 }
  0x7b   : > { %1471 = dma.done.wait (%p1992_p8), [#allocation8], 384   ;;  %p1993_p11 = pmov %p1992_p8 }
  0x7c   : > { %p1994_p2 = pmov %p1992_p8 }
  0x7d   : > { %1473 = vsyncadd (%p1993_p11), [#allocation8], 4294966912 }
  0x7e   : > { %1475 = dma.done.wait (%p1994_p2), [#allocation11], 128   ;;  %p1995_p6 = pmov %p1994_p2 }
  0x7f   : > { %v1506_v0 = vmov 0.0   ;;  %vm1507_vm0 = vmmov 0   ;;  %v324_v1 = vld [vmem:[%s1710_s5 + $0x140] sm:$0xff]  ;;  %v325_v2 = vld [vmem:[%s1710_s5 + $0x148] sm:$0xff]  ;;  %v323_v3 = vld [vmem:[%s1710_s5 + $0x138] sm:$0xff]  ;;  %vm326_vm1 = vcmask 916480  }
  0x80   : > { %1477 = vsyncadd (%p1995_p6), [#allocation11], 4294967168  ;;  %1131 = vmatprep.subr.mxu1 %v1506_v0  ;;  %1159 = vmatprep.mubr.msk.f32.mxu1 %vm1507_vm0, %v1506_v0  ;;  %v321_v4 = vld [vmem:[%s1710_s5 + $0x128] sm:$0xff]  ;;  %v322_v5 = vld [vmem:[%s1710_s5 + $0x130] sm:$0xff]  ;;  %s1508_s21 = smov 109   ;;  %s1509_s10 = smov 110  }
  0x81   : > { %400 = vmatprep.mubr.f32.mxu0 %v1506_v0  ;;  %340 = vmatprep.subr.mxu0 %v324_v1  ;;  %v320_v6 = vld [vmem:[%s1710_s5 + $0x120] sm:$0xff]  ;;  %v318_v7 = vld [vmem:[%s1710_s5 + $0x110] sm:$0xff]  ;;  %v319_v8 = vld [vmem:[%s1710_s5 + $0x118] sm:$0xff]  ;;  %s1510_s24 = smov 127   ;;  %s1511_s30 = smov 111   ;;  %vm746_vm2 = vcmask 891904  }
  0x82   : > { %1132 = vmatpush3.msra.mxu1 %v325_v2  ;;  %341 = vmatpush1.msra.mxu0 %v323_v3  ;;  %v317_v9 = vld [vmem:[%s1710_s5 + $0x108] sm:$0xff]  ;;  %v315_v10 = vld [vmem:[%s1710_s5 + $0xf8] sm:$0xff]  ;;  %v316_v11 = vld [vmem:[%s1710_s5 + $0x100] sm:$0xff]  ;;  %s1512_s6 = smov 17   ;;  %s1513_s8 = smov 1   ;;  %vm720_vm3 = vcmask 900096  }
  0x83   : > { %1133 = vmatprep.subr.mxu1 %v1506_v0  ;;  %342 = vmatprep.subr.mxu0 %v321_v4  ;;  %v314_v12 = vld [vmem:[%s1710_s5 + $0xf0] sm:$0xff]  ;;  %v312_v13 = vld [vmem:[%s1710_s5 + $0xe0] sm:$0xff]  ;;  %v313_v14 = vld [vmem:[%s1710_s5 + $0xe8] sm:$0xff]  ;;  %s1514_s9 = smov 18   ;;  %s1515_s12 = smov 19   ;;  %vm694_vm4 = vcmask 908288  }
  0x84   : > { %1134 = vmatpush3.msra.mxu1 %v322_v5  ;;  %343 = vmatpush1.msra.mxu0 %v320_v6  ;;  %v311_v15 = vld [vmem:[%s1710_s5 + $0xd8] sm:$0xff]  ;;  %v309_v16 = vld [vmem:[%s1710_s5 + $0xc8] sm:$0xff]  ;;  %v310_v17 = vld [vmem:[%s1710_s5 + $0xd0] sm:$0xff]  ;;  %vm668_vm5 = vcmask 1039360   ;;  %vm639_vm6 = vcmask 7168   ;;  %vm613_vm7 = vcmask 138240  }
  0x85   : > { %1135 = vmatprep.subr.mxu1 %v1506_v0  ;;  %344 = vmatprep.subr.mxu0 %v318_v7  ;;  %v308_v18 = vld [vmem:[%s1710_s5 + $0xc0] sm:$0xff]  ;;  %v306_v19 = vld [vmem:[%s1710_s5 + $0xb0] sm:$0xff]  ;;  %v307_v20 = vld [vmem:[%s1710_s5 + $0xb8] sm:$0xff]  ;;  %vm587_vm8 = vcmask 146432   ;;  %vm561_vm9 = vcmask 154624   ;;  %vm784_vm10 = vcmask 588800  }
  0x86   : > { %1136 = vmatpush3.msra.mxu1 %v319_v8  ;;  %345 = vmatpush1.msra.mxu0 %v317_v9  ;;  %v305_v21 = vld [vmem:[%s1710_s5 + $0xa8] sm:$0xff]  ;;  %v303_v22 = vld [vmem:[%s1710_s5 + $0x98] sm:$0xff]  ;;  %v304_v23 = vld [vmem:[%s1710_s5 + $0xa0] sm:$0xff]  ;;  %s1195_s7 = smul.u32 384, %s1563_s19  ;;  %s280_s13 = scalar_lea.vmem [#allocation12], %s1194_s23 }
  0x87   : > { %1137 = vmatprep.subr.mxu1 %v1506_v0  ;;  %346 = vmatprep.subr.mxu0 %v315_v10  ;;  %v302_v24 = vld [vmem:[%s1710_s5 + $0x90] sm:$0xff]  ;;  %v300_v25 = vld [vmem:[%s1710_s5 + $0x80] sm:$0xff]  ;;  %v301_v26 = vld [vmem:[%s1710_s5 + $0x88] sm:$0xff]  ;;  %s965_s26 = sshll.u32 %s280_s13, 4  ;;  %s951_s0 = scalar_lea.sflag [#allocation6], %s1706_s2  ;;  %s966_s26 = int_to_ptr.vmem [resolvable:$true] %s965_s26 }
  0x88   : > { %1138 = vmatpush3.msra.mxu1 %v316_v11  ;;  %347 = vmatpush1.msra.mxu0 %v314_v12  ;;  %v299_v27 = vld [vmem:[%s1710_s5 + $0x78] sm:$0xff]  ;;  %v297_v28 = vld [vmem:[%s1710_s5 + $0x68] sm:$0xff]  ;;  %v298_v29 = vld [vmem:[%s1710_s5 + $0x70] sm:$0xff]  ;;  %s1420_s19 = scalar_lea.vmem %s966_s26, 384  ;;  %p1996_p7 = scmp.ne.s32.totalorder %s1987_s14, 0 }
  0x89   : > { %1139 = vmatprep.subr.mxu1 %v1506_v0  ;;  %348 = vmatprep.subr.mxu0 %v312_v13  ;;  %v296_v30 = vld [vmem:[%s1710_s5 + $0x60] sm:$0xff]  ;;  %v294_v31 = vld [vmem:[%s1710_s5 + $0x50] sm:$0xff]  ;;  %v295_v32 = vld [vmem:[%s1710_s5 + $0x58] sm:$0xff]  ;;  %p1421_p12 = scmp.ne.s32.totalorder %s966_s26, %s1420_s19  ;;  %s1516_s23 = smov [#allocation12]  }
  0x8a   : > { %1140 = vmatpush3.msra.mxu1 %v313_v14  ;;  %349 = vmatpush1.msra.mxu0 %v311_v15  ;;  %v293_v33 = vld [vmem:[%s1710_s5 + $0x48] sm:$0xff]  ;;  %v291_v34 = vld [vmem:[%s1710_s5 + $0x38] sm:$0xff]  ;;  %v292_v35 = vld [vmem:[%s1710_s5 + $0x40] sm:$0xff]  ;;  %s1424_s27 = sshll.u32 %s1516_s23, 4  ;;  %s1425_s27 = int_to_ptr.vmem [resolvable:$false] %s1424_s27 }
  0x8b   : > { %1141 = vmatprep.subr.mxu1 %v1506_v0  ;;  %350 = vmatprep.subr.mxu0 %v309_v16  ;;  %v290_v36 = vld [vmem:[%s1710_s5 + $0x30] sm:$0xff]  ;;  %v288_v37 = vld [vmem:[%s1710_s5 + $0x20] sm:$0xff]  ;;  %v289_v38 = vld [vmem:[%s1710_s5 + $0x28] sm:$0xff]  ;;  %p1422_p9 = pnand %p1421_p12, %p1996_p7  ;;  %p1427_p5 = scmp.lt.s32.totalorder %s966_s26, %s1425_s27 }
  0x8c   : > { %1142 = vmatpush3.msra.mxu1 %v310_v17  ;;  %351 = vmatpush1.msra.mxu0 %v308_v18  ;;  %v287_v39 = vld [vmem:[%s1710_s5 + $0x18] sm:$0xff]  ;;  %v285_v40 = vld [vmem:[%s1710_s5 + $0x8] sm:$0xff]  ;;  %v286_v41 = vld [vmem:[%s1710_s5 + $0x10] sm:$0xff] }
  0x8d   : > { %1143 = vmatprep.subr.mxu1 %v1506_v0  ;;  %352 = vmatprep.subr.mxu0 %v306_v19  ;;  %v284_v42 = vld [vmem:[%s1710_s5] sm:$0xff]  ;;  %v282_v44 = vld [vmem:[#allocation9 + $0x8] sm:$0xff]  ;;  %v537_v10 = vld [vmem:[%s1720_s29 + $0x10] sm:$0xff]  ;;  %s963_s5 = scalar_lea.hbm %s1974_s4, %s1195_s7  ;;  %p1423_p13 = pneg %p1422_p9 }
  0x8e   : > { %1144 = vmatpush3.msra.mxu1 %v307_v20  ;;  %353 = vmatpush1.msra.mxu0 %v305_v21  ;;  %v281_v43 = vld [vmem:[#allocation9] sm:$0xff]  ;;  %v535_v13 = vld [vmem:[%s1720_s29] sm:$0xff]  ;;  %v536_v16 = vld [vmem:[%s1720_s29 + $0x8] sm:$0xff]  ;;  %s1426_s29 = scalar_lea.vmem %s1425_s27, 768 }
  0x8f   : > { %1145 = vmatprep.subr.mxu1 %v1506_v0  ;;  %354 = vmatprep.subr.mxu0 %v303_v22  ;;  %v733_v45 = vld [vmem:[#allocation3 + $0x18] sm:$0xff]  ;;  %p1428_p1 = scmp.lt.s32.totalorder %s1426_s29, %s1420_s19 }
  0x90   : > { %1146 = vmatpush3.msra.mxu1 %v304_v23  ;;  %355 = vmatpush1.msra.mxu0 %v302_v24 }
  0x91   : > { %1147 = vmatprep.subr.mxu1 %v1506_v0  ;;  %356 = vmatprep.subr.mxu0 %v300_v25  ;;  %p1429_p4 = por %p1428_p1, %p1427_p5 }
  0x92   : > { %1148 = vmatpush3.msra.mxu1 %v301_v26  ;;  %357 = vmatpush1.msra.mxu0 %v299_v27  ;;  %v283_v27 = vld [vmem:[#allocation9 + $0x10] sm:$0xff] }
  0x93   : > { %1149 = vmatprep.subr.mxu1 %v1506_v0  ;;  %358 = vmatprep.subr.mxu0 %v297_v28  ;;  %p1430_p3 = pnand %p1429_p4, %p1423_p13 }
  0x94   : > { %1150 = vmatpush3.msra.mxu1 %v298_v29  ;;  %359 = vmatpush1.msra.mxu0 %v296_v30 }
  0x95   : > { %1151 = vmatprep.subr.mxu1 %v1506_v0  ;;  %360 = vmatprep.subr.mxu0 %v294_v31 }
  0x96   : > { %1152 = vmatpush3.msra.mxu1 %v295_v32  ;;  %361 = vmatpush1.msra.mxu0 %v293_v33 }
  0x97   : > { %1153 = vmatprep.subr.mxu1 %v1506_v0  ;;  %362 = vmatprep.subr.mxu0 %v291_v34 }
  0x98   : > { %1154 = vmatpush3.msra.mxu1 %v292_v35  ;;  %363 = vmatpush1.msra.mxu0 %v290_v36 }
  0x99   : > { %1155 = vmatprep.subr.mxu1 %v1506_v0  ;;  %364 = vmatprep.subr.mxu0 %v288_v37 }
  0x9a   : > { %1156 = vmatpush3.msra.mxu1 %v289_v38  ;;  %365 = vmatpush1.msra.mxu0 %v287_v39 }
  0x9b   : > { %1157 = vmatprep.subr.mxu1 %v1506_v0  ;;  %366 = vmatprep.subr.mxu0 %v285_v40 }
  0x9c   : > { %1158 = vmatpush3.msra.mxu1 %v286_v41  ;;  %367 = vmatpush1.msra.mxu0 %v284_v42 }
  0x9d   : > { %1160 = vmatmul.mubr.msk.f32.vlgmr.msra.gmra.mxu1 %vm326_vm1, %v281_v43  ;;  %1087 = vmatmul.mubr.msk.f32.vlgmr.msra.gmra.mxu0 %vm326_vm1, %v281_v43 }
  0x9e   : > { %1162 = vmatprep.mubr.msk.f32.mxu1 %vm1507_vm0, %v1506_v0  ;;  %406 = vmatprep.mubr.f32.mxu0 %v1506_v0 }
  0x9f   : > { %1168 = vmatprep.subr.mxu1 %v1506_v0  ;;  %744 = vrot.lane.b32.xlu0 %v733_v45, %s1508_s21 }
  0xa0   : > { %666 = vrot.lane.b32.xlu1 %v733_v45, %s1510_s24 }
  0xa1   : > { %1163 = vmatmul.mubr.msk.f32.gmra.mxu1 %vm326_vm1, %v282_v44  ;;  %1088 = vmatmul.mubr.msk.f32.gmra.mxu0 %vm326_vm1, %v282_v44 }
  0xa2   : > { %1165 = vmatprep.mubr.msk.f32.mxu1 %vm1507_vm0, %v1506_v0  ;;  %412 = vmatprep.mubr.f32.mxu0 %v1506_v0 }
  0xa3   : > { %718 = vrot.lane.b32.xlu0 %v733_v45, %s1509_s10 }
  0xa4   : > { %605 = vrot.lane.b32.xlu1 %v1506_v0, %s1512_s6 }
  0xa5   : > { %1089 = vmatmul.mubr.msk.f32.gmra.mxu0 %vm326_vm1, %v283_v27  ;;  %1166 = vmatmul.mubr.msk.f32.gmra.mxu1 %vm326_vm1, %v283_v27 }
  0xa6   : > { %852 = vmatprep.mubr.f32.mxu0 %v1506_v0  ;;  %1186 = vmatprep.mubr.msk.f32.mxu1 %vm1507_vm0, %v1506_v0 }
  0xa7   : > { %692 = vrot.lane.b32.xlu0 %v733_v45, %s1511_s30 }
  0xa8   : > { %579 = vrot.lane.b32.xlu1 %v1506_v0, %s1514_s9 }
  0xab   : > { %631 = vrot.lane.b32.xlu0 %v1506_v0, %s1513_s8 }
 0x111   : > { %v745_v28 = vpop.permute.xlu0 %744 }
 0x112   : > { %v667_v30 = vpop.permute.xlu1 %666 }
 0x115   : > { %v719_v29 = vpop.permute.xlu0 %718 }
 0x116   : > { %v1889_v32 = vpop.permute.xlu1 %605 }
 0x119   : > { %v693_v31 = vpop.permute.xlu0 %692 }
 0x11a   : > { %v1893_v34 = vpop.permute.xlu1 %579 }
 0x11d   : > { %v1891_v33 = vpop.permute.xlu0 %631 }
 0x15d   : > { %v485_v46 = vpop.f32.mrf.mxu1  ;;  %v402_v48 = vpop.f32.mrf.mxu0 }
 0x15e   : > { %v1095_v47 = vmul.f32 -1.442695, %v485_v46  ;;  %v1093_v49 = vmul.f32 -1.442695, %v402_v48 }
 0x15f   : > { %v1161_v50 = vpop.f32.mrf.mxu1  ;;  %v404_v51 = vpop.f32.mrf.mxu0 }
 0x160   : > { %1282 = vpow2.f32 %v1095_v47  ;;  %v1094_v52 = vmul.f32 -1.442695, %v404_v51 }
 0x161   : > { %1284 = vpow2.f32 %v1093_v49  ;;  %v490_v53 = vpop.f32.mrf.mxu1  ;;  %v408_v55 = vpop.f32.mrf.mxu0 }
 0x162   : > { %v1098_v54 = vmul.f32 -1.442695, %v490_v53  ;;  %1286 = vpow2.f32 %v1094_v52  ;;  %v1096_v56 = vmul.f32 -1.442695, %v408_v55 }
 0x163   : > { %v1164_v57 = vpop.f32.mrf.mxu1  ;;  %v410_v58 = vpop.f32.mrf.mxu0 }
 0x164   : > { %1288 = vpow2.f32 %v1098_v54  ;;  %v1097_v59 = vmul.f32 -1.442695, %v410_v58 }
 0x165   : > { %1290 = vpow2.f32 %v1096_v56 }
 0x166   : > { %1292 = vpow2.f32 %v1097_v59 }
 0x16d   : > { %v1283_v60 = vpop.eup %1282 }
 0x16e   : > { %v1285_v61 = vpop.eup %1284  ;;  %v510_v62 = vadd.f32 1.0, %v1283_v60 }
 0x16f   : > { %v508_v63 = vadd.f32 1.0, %v1285_v61  ;;  %v1287_v1 = vpop.eup %1286 }
 0x170   : > { %1294 = vrcp.f32 %v510_v62  ;;  %v509_v3 = vadd.f32 1.0, %v1287_v1 }
 0x171   : > { %v1289_v2 = vpop.eup %1288  ;;  %1296 = vrcp.f32 %v508_v63 }
 0x172   : > { %v1291_v4 = vpop.eup %1290  ;;  %v528_v5 = vadd.f32 1.0, %v1289_v2  ;;  %1298 = vrcp.f32 %v509_v3 }
 0x173   : > { %v526_v6 = vadd.f32 1.0, %v1291_v4  ;;  %v1293_v7 = vpop.eup %1292 }
 0x174   : > { %1300 = vrcp.f32 %v528_v5  ;;  %v527_v8 = vadd.f32 1.0, %v1293_v7 }
 0x175   : > { %1302 = vrcp.f32 %v526_v6 }
 0x176   : > { %1304 = vrcp.f32 %v527_v8 }
 0x17d   : > { %v1814_v9 = vpop.eup %1294 }
 0x17e   : > { %v1817_v11 = vpop.eup %1296  ;;  %v937_v12 = vsub.f32 1.0, %v1814_v9 }
 0x17f   : > { %v935_v14 = vsub.f32 1.0, %v1817_v11  ;;  %v1822_v15 = vpop.eup %1298 }
 0x180   : > { %v1825_v17 = vmul.f32 %v937_v12, %v537_v10  ;;  %v936_v19 = vsub.f32 1.0, %v1822_v15 }
 0x181   : > { %v1301_v18 = vpop.eup %1300  ;;  %v1828_v20 = vmul.f32 %v935_v14, %v535_v13 }
 0x182   : > { %v1303_v21 = vpop.eup %1302  ;;  %v1830_v22 = vmul.f32 %v1301_v18, %v537_v10  ;;  %v1834_v24 = vmul.f32 %v936_v19, %v536_v16 }
 0x183   : > { %v1832_v23 = vmul.f32 %v1303_v21, %v535_v13  ;;  %v1305_v25 = vpop.eup %1304 }
 0x184   : > { %742 = vrot.lane.b32.xlu0 %v1830_v22, %s1508_s21  ;;  %v1838_v26 = vmul.f32 %v1305_v25, %v536_v16 }
 0x185   : > { %738 = vrot.lane.b32.xlu1 %v1832_v23, %s1508_s21 }
 0x188   : > { %716 = vrot.lane.b32.xlu0 %v1830_v22, %s1509_s10 }
 0x189   : > { %712 = vrot.lane.b32.xlu1 %v1832_v23, %s1509_s10 }
 0x18c   : > { %690 = vrot.lane.b32.xlu0 %v1830_v22, %s1511_s30 }
 0x18d   : > { %686 = vrot.lane.b32.xlu1 %v1832_v23, %s1511_s30 }
 0x190   : > { %664 = vrot.lane.b32.xlu0 %v1830_v22, %s1510_s24 }
 0x191   : > { %660 = vrot.lane.b32.xlu1 %v1832_v23, %s1510_s24 }
 0x194   : > { %637 = vrot.lane.b32.xlu0 %v1830_v22, %s1513_s8 }
 0x195   : > { %607 = vrot.lane.b32.xlu1 %v1832_v23, %s1512_s6 }
 0x198   : > { %633 = vrot.lane.b32.xlu0 %v1832_v23, %s1513_s8 }
 0x199   : > { %581 = vrot.lane.b32.xlu1 %v1832_v23, %s1514_s9 }
 0x19c   : > { %740 = vrot.lane.b32.xlu0 %v1838_v26, %s1508_s21 }
 0x19d   : > { %714 = vrot.lane.b32.xlu1 %v1838_v26, %s1509_s10 }
 0x1a0   : > { %611 = vrot.lane.b32.xlu0 %v1830_v22, %s1512_s6 }
 0x1a1   : > { %688 = vrot.lane.b32.xlu1 %v1838_v26, %s1511_s30 }
 0x1a4   : > { %609 = vrot.lane.b32.xlu0 %v1838_v26, %s1512_s6 }
 0x1a5   : > { %662 = vrot.lane.b32.xlu1 %v1838_v26, %s1510_s24 }
 0x1a8   : > { %583 = vrot.lane.b32.xlu0 %v1838_v26, %s1514_s9 }
 0x1a9   : > { %635 = vrot.lane.b32.xlu1 %v1838_v26, %s1513_s8 }
 0x1ac   : > { %557 = vrot.lane.b32.xlu0 %v1838_v26, %s1515_s12 }
 0x1ad   : > { %555 = vrot.lane.b32.xlu1 %v1832_v23, %s1515_s12 }
 0x1b0   : > { %585 = vrot.lane.b32.xlu0 %v1830_v22, %s1514_s9 }
 0x1b1   : > { %553 = vrot.lane.b32.xlu1 %v1506_v0, %s1515_s12 }
 0x1b5   : > { %559 = vrot.lane.b32.xlu1 %v1830_v22, %s1515_s12 }
 0x1f6   : > { %v743_v35 = vpop.permute.xlu0 %742 }
 0x1f7   : > { %v749_v36 = vsel %vm746_vm2, %v743_v35, %v745_v28  ;;  %v739_v37 = vpop.permute.xlu1 %738  ;;  %v495_v28 = vpop.f32.mrf.mxu1 }
 0x1f8   : > { %1169 = vmatpush3.msra.mxu1 %v749_v36 }
 0x1f9   : > { %1170 = vmatprep.subr.mxu1 %v1506_v0 }
 0x1fa   : > { %v717_v38 = vpop.permute.xlu0 %716 }
 0x1fb   : > { %v723_v39 = vsel %vm720_vm3, %v717_v38, %v719_v29  ;;  %v713_v40 = vpop.permute.xlu1 %712  ;;  %v1167_v29 = vpop.f32.mrf.mxu1 }
 0x1fc   : > { %1171 = vmatpush3.msra.mxu1 %v723_v39 }
 0x1fd   : > { %1172 = vmatprep.subr.mxu1 %v1506_v0 }
 0x1fe   : > { %v691_v41 = vpop.permute.xlu0 %690 }
 0x1ff   : > { %v697_v42 = vsel %vm694_vm4, %v691_v41, %v693_v31  ;;  %v687_v43 = vpop.permute.xlu1 %686 }
 0x200   : > { %1173 = vmatpush3.msra.mxu1 %v697_v42 }
 0x201   : > { %1174 = vmatprep.subr.mxu1 %v1506_v0 }
 0x202   : > { %v665_v44 = vpop.permute.xlu0 %664 }
 0x203   : > { %v671_v45 = vsel %vm668_vm5, %v665_v44, %v667_v30  ;;  %v661_v46 = vpop.permute.xlu1 %660  ;;  %v414_v30 = vpop.f32.mrf.mxu0 }
 0x204   : > { %1175 = vmatpush3.msra.mxu1 %v671_v45 }
 0x205   : > { %1176 = vmatprep.subr.mxu1 %v1506_v0  ;;  %v416_v31 = vpop.f32.mrf.mxu0 }
 0x206   : > { %1177 = vmatpush3.msra.mxu1 %v1830_v22  ;;  %v638_v47 = vpop.permute.xlu0 %637 }
 0x207   : > { %v608_v48 = vpop.permute.xlu1 %607  ;;  %1178 = vmatprep.subr.mxu1 %v1506_v0 }
 0x208   : > { %v614_v12 = vsel %vm613_vm7, %v1889_v32, %v608_v48 }
 0x20a   : > { %v634_v49 = vpop.permute.xlu0 %633 }
 0x20b   : > { %v582_v50 = vpop.permute.xlu1 %581  ;;  %v640_v6 = vsel %vm639_vm6, %v1891_v33, %v634_v49 }
 0x20c   : > { %v588_v16 = vsel %vm587_vm8, %v1893_v34, %v582_v50 }
 0x20e   : > { %v741_v51 = vpop.permute.xlu0 %740 }
 0x20f   : > { %v747_v52 = vsel %vm746_vm2, %v739_v37, %v741_v51  ;;  %v715_v53 = vpop.permute.xlu1 %714  ;;  %v748_v54 = vsel %vm746_vm2, %v741_v51, %v743_v35 }
 0x210   : > { %802 = vmatprep.subr.mxu0 %v748_v54  ;;  %v722_v55 = vsel %vm720_vm3, %v715_v53, %v717_v38  ;;  %v721_v56 = vsel %vm720_vm3, %v713_v40, %v715_v53 }
 0x211   : > { %803 = vmatpush1.msra.mxu0 %v747_v52 }
 0x212   : > { %v612_v57 = vpop.permute.xlu0 %611  ;;  %804 = vmatprep.subr.mxu0 %v722_v55 }
 0x213   : > { %805 = vmatpush1.msra.mxu0 %v721_v56  ;;  %v689_v58 = vpop.permute.xlu1 %688 }
 0x214   : > { %v695_v59 = vsel %vm694_vm4, %v687_v43, %v689_v58  ;;  %v696_v60 = vsel %vm694_vm4, %v689_v58, %v691_v41 }
 0x215   : > { %806 = vmatprep.subr.mxu0 %v696_v60 }
 0x216   : > { %807 = vmatpush1.msra.mxu0 %v695_v59  ;;  %v610_v61 = vpop.permute.xlu0 %609 }
 0x217   : > { %v663_v62 = vpop.permute.xlu1 %662  ;;  %v616_v7 = vsel %vm613_vm7, %v610_v61, %v612_v57  ;;  %v615_v10 = vsel %vm613_vm7, %v608_v48, %v610_v61 }
 0x218   : > { %v669_v63 = vsel %vm668_vm5, %v661_v46, %v663_v62  ;;  %v670_v1 = vsel %vm668_vm5, %v663_v62, %v665_v44 }
 0x219   : > { %808 = vmatprep.subr.mxu0 %v670_v1 }
 0x21a   : > { %809 = vmatpush1.msra.mxu0 %v669_v63  ;;  %v584_v2 = vpop.permute.xlu0 %583 }
 0x21b   : > { %810 = vmatprep.subr.mxu0 %v1838_v26  ;;  %v636_v3 = vpop.permute.xlu1 %635  ;;  %v589_v14 = vsel %vm587_vm8, %v582_v50, %v584_v2 }
 0x21c   : > { %v642_v4 = vsel %vm639_vm6, %v636_v3, %v638_v47  ;;  %811 = vmatpush1.msra.mxu0 %v1832_v23  ;;  %v641_v5 = vsel %vm639_vm6, %v634_v49, %v636_v3  ;;  %v756_v23 = vld [vmem:[#allocation10] sm:$0xff] }
 0x21d   : > { %812 = vmatprep.subr.mxu0 %v641_v5  ;;  %1179 = vmatpush3.msra.mxu1 %v642_v4 }
 0x21e   : > { %813 = vmatpush1.msra.mxu0 %v640_v6  ;;  %1180 = vmatprep.subr.mxu1 %v1506_v0  ;;  %v558_v8 = vpop.permute.xlu0 %557 }
 0x21f   : > { %v556_v13 = vpop.permute.xlu1 %555  ;;  %814 = vmatprep.subr.mxu0 %v615_v10  ;;  %1181 = vmatpush3.msra.mxu1 %v616_v7 }
 0x220   : > { %815 = vmatpush1.msra.mxu0 %v614_v12  ;;  %1182 = vmatprep.subr.mxu1 %v1506_v0  ;;  %v563_v19 = vsel %vm561_vm9, %v556_v13, %v558_v8 }
 0x221   : > { %816 = vmatprep.subr.mxu0 %v589_v14 }
 0x222   : > { %817 = vmatpush1.msra.mxu0 %v588_v16  ;;  %v586_v18 = vpop.permute.xlu0 %585 }
 0x223   : > { %v590_v21 = vsel %vm587_vm8, %v584_v2, %v586_v18  ;;  %v554_v22 = vpop.permute.xlu1 %553  ;;  %818 = vmatprep.subr.mxu0 %v563_v19 }
 0x224   : > { %v562_v25 = vsel %vm561_vm9, %v554_v22, %v556_v13  ;;  %1183 = vmatpush3.msra.mxu1 %v590_v21 }
 0x225   : > { %819 = vmatpush1.msra.mxu0 %v562_v25  ;;  %1184 = vmatprep.subr.mxu1 %v1506_v0 }
 0x226   : > { %1099 = vmatmul.mubr.msk.f32.vlgmr.msra.gmra.mxu0 %vm784_vm10, %v756_v23 }
 0x227   : > { %v560_v26 = vpop.permute.xlu1 %559 }
 0x228   : > { %v564_v27 = vsel %vm561_vm9, %v558_v8, %v560_v26 }
 0x229   : > { %1185 = vmatpush3.msra.mxu1 %v564_v27 }
 0x22a   : > { %1187 = vmatmul.mubr.msk.f32.vlgmr.msra.gmra.mxu1 %vm784_vm10, %v756_v23 }
 0x2e6   : > { %v854_v32 = vpop.f32.mrf.mxu0 }
 0x2e7   : > { %v929_v33 = vadd.f32 %v854_v32, %v414_v30 }
 0x2e8   : > { %v856_v34 = vpop.f32.mrf.mxu0 }
 0x2e9   : > { %1306 = vtanh.f32 %v929_v33  ;;  %v930_v35 = vadd.f32 %v856_v34, %v416_v31 }
 0x2ea   : > { %v925_v36 = vpop.f32.mrf.mxu1 }
 0x2eb   : > { %1308 = vtanh.f32 %v930_v35  ;;  %v931_v0 = vadd.f32 %v925_v36, %v495_v28 }
 0x2ec   : > { %v1188_v37 = vpop.f32.mrf.mxu1 }
 0x2ed   : > { %1310 = vtanh.f32 %v931_v0 }
 0x2f6   : > { %v1307_v38 = vpop.eup %1306 }
 0x2f7   : > { %v941_v39 = vmul.f32 %v1307_v38, %v1817_v11 }
 0x2f8   : > { %v1309_v40 = vpop.eup %1308 }
 0x2f9   : > { %v942_v41 = vmul.f32 %v1309_v40, %v1822_v15  ;;  %v944_v42 = vadd.f32 %v941_v39, %v1828_v20 }
 0x2fa   : > { %v1311_v43 = vpop.eup %1310 }
 0x2fb   : > { %v943_v44 = vmul.f32 %v1311_v43, %v1814_v9  ;;  %v945_v45 = vadd.f32 %v942_v41, %v1834_v24  ;;  %947 = vst [vmem:[%s280_s13] sm:$0xff] %v944_v42 }
 0x2fd   : > { %v946_v46 = vadd.f32 %v943_v44, %v1825_v17  ;;  %948 = vst [vmem:[%s280_s13 + $0x8] sm:$0xff] %v945_v45 }
 0x2ff   : > { %949 = vst [vmem:[%s280_s13 + $0x10] sm:$0xff] %v946_v46 }
 0x300   : > { %1433 = shalt.err (!%p1430_p3)
}
 0x301   : > { %s1434_s21 = scalar_lea.hbm %s963_s5, 384  ;;  %s1438_s24 = scalar_lea.hbm %s1974_s4, 768 }
 0x302   : > { %p1435_p10 = scmp.ne.s32.totalorder %s963_s5, %s1434_s21  ;;  %p1439_p11 = scmp.lt.s32.totalorder %s963_s5, %s1974_s4 }
 0x303   : > { %p1440_p2 = scmp.lt.s32.totalorder %s1438_s24, %s1434_s21 }
 0x304   : > { %p1436_p0 = pnand %p1435_p10, %p1996_p7 }
 0x305   : > { %p1441_p6 = por %p1440_p2, %p1439_p11 }
 0x306   : > { %p1437_p8 = pneg %p1436_p0 }
 0x308   : > { %p1442_p12 = pnand %p1441_p6, %p1437_p8 }
 0x30a   : > { %1445 = shalt.err (!%p1442_p12)
}
 0x30b   : > { %1208 = dma.vmem_to_hbm [thread:$0]  (%p1996_p7), %s966_s26, 384, %s963_s5, %s951_s0  }
 0x30c PF: > { %s977_s8 = sand.u32 1, %s1484_s15   ;;  %p1997_p9 = scmp.ne.s32.totalorder %s1982_s22, 0 }
 0x30d   : > { %p1998_p13 = scmp.ge.s32.totalorder %s1496_s18, 2  ;;  %s978_s9 = scalar_lea.sflag [#allocation6], %s977_s8 }
 0x30f   : > { %p1225_p5 = pnand %p1998_p13, %p1997_p9 }
 0x311   : > { %p1226_p1 = pneg %p1225_p5 }
 0x313   : > { %1479 = dma.done.wait (%p1226_p1), %s978_s9, 384  }
 0x314   : > { %1481 = vsyncadd (%p1226_p1), %s978_s9, 4294966912  ;;  %p21_p4 = scmp.ge.s32.totalorder %s1614_s11, 4   ;;  %s1999_s15 = smov %s1488_s16 }
 0x315   : > { %s2000_s16 = smov %s1492_s17  ;;  %s2001_s17 = smov %s1630_s20 }
 0x316   : > { %s2002_s18 = smov %s1614_s11  ;;  %23 = sbr.rel (!%p21_p4) target bundleno = 11 (0xb), region = 102 }
 0x31b   :  { %983 = vsyncpa [#allocation5], 1 }
 0x31c   :  { %985 = vsyncpa [#allocation5 + $0x1], 1 }
 0x31d   :  { %986 = vsyncpa [#allocation8], 1 }
 0x31e   :  { %988 = vsyncpa [#allocation8 + $0x1], 1 }
 0x31f   :  { %989 = vsyncpa [#allocation11], 1 }
 0x320   :  { %990 = vsyncpa [#allocation6], 1 }
 0x321   :  { %992 = vsyncpa [#allocation6 + $0x1], 1 }

</bundles_post_ra>
